<compile_context>
chip_gen: v7x
topology: tpu7x:2x2x1
jax: 0.10.0
libtpu: 0.0.40
codegen_flags: <defaults>
</compile_context>

<pallas_src>
import jax
import jax.numpy as jnp
from jax.experimental import pallas as pl
from jax.experimental.pallas import tpu as pltpu

REG_WEIGHT = 0.1
LANE = 128
MAX_SUBLANE_TILE = 512          # (512, 128) f32 tile = 256 KiB per buffer
_NEG_FILL = -1e30               # pad/init value: exp underflows to exactly 0,
                                # finite so 0 * fill == 0 (no NaN), < any real data.


def _pos_stats_kernel(x_ref, pos_max_ref, ent_ref,
                      m_sc, z_sc, s_sc, ent_sc, gmax_sc):
    """Streams one (tb, 128) tile of one positive-bag row per grid step."""
    bi = pl.program_id(0)            # batch row (outer)
    ki = pl.program_id(1)            # feature-tile index (reduction axis, inner)
    nb = pl.num_programs(0)
    nk = pl.num_programs(1)

    # ---- whole-grid accumulators ----------------------------------------
    @pl.when(jnp.logical_and(bi == 0, ki == 0))
    def _():
        ent_sc[...] = jnp.zeros_like(ent_sc)
        gmax_sc[...] = jnp.full_like(gmax_sc, _NEG_FILL)

    # ---- per-row online-softmax accumulators (reset each row) -----------
    @pl.when(ki == 0)
    def _():
        m_sc[...] = jnp.full_like(m_sc, _NEG_FILL)
        z_sc[...] = jnp.zeros_like(z_sc)
        s_sc[...] = jnp.zeros_like(s_sc)

    x = x_ref[...]                                             # (tb, 128) f32

    # block max -> (1, 1)
    blk_max = jnp.max(jnp.max(x, axis=1, keepdims=True), axis=0, keepdims=True)

    m_old = m_sc[...]
    z_old = z_sc[...]
    s_old = s_sc[...]

    m_new = jnp.maximum(m_old, blk_max)                        # (1, 1)
    alpha = jnp.exp(m_old - m_new)                             # rescale factor

    shifted = x - m_new                                        # (tb, 128)
    e = jnp.exp(shifted)                                       # single EUP pass
    z_blk = jnp.sum(jnp.sum(e, axis=1, keepdims=True), axis=0, keepdims=True)
    s_blk = jnp.sum(jnp.sum(e * shifted, axis=1, keepdims=True),
                    axis=0, keepdims=True)

    # exact online rescaling of the running sums when the max grows
    z_sc[...] = alpha * z_old + z_blk
    s_sc[...] = alpha * (s_old + (m_old - m_new) * z_old) + s_blk
    m_sc[...] = m_new

    # ---- end of a row: fold this row into the global accumulators -------
    @pl.when(ki == nk - 1)
    def _():
        z = z_sc[...]
        row_entropy = jnp.log(z) - s_sc[...] * pl.reciprocal(z, approx=True)
        ent_sc[...] = ent_sc[...] + row_entropy
        gmax_sc[...] = jnp.maximum(gmax_sc[...], m_sc[...])

    # ---- end of the grid: write both scalar outputs exactly once --------
    @pl.when(jnp.logical_and(bi == nb - 1, ki == nk - 1))
    def _():
        pos_max_ref[...] = gmax_sc[...]
        ent_ref[...] = ent_sc[...]


def custom_loss_with_regularization(positive_bag, negative_bag,
                                    regularization_weight=REG_WEIGHT):
    """positive_bag, negative_bag: NCHW-like float arrays (any rank >= 1)."""
    b = positive_bag.shape[0]
    pos = jnp.reshape(positive_bag, (b, -1)).astype(jnp.float32)
    f = pos.shape[1]

    # Pack each row's features into full (sublane, lane) tiles: (b, nb, 128).
    nb = pl.cdiv(f, LANE)                              # 128-lane rows per batch row
    tb = min(MAX_SUBLANE_TILE, ((nb + 7) // 8) * 8)    # sublane tile, multiple of 8
    nb_pad = pl.cdiv(nb, tb) * tb
    f_pad = nb_pad * LANE
    if f_pad != f:
        # Very negative finite padding: exp underflows to exactly 0, so padded
        # elements contribute nothing to the max / Z / S accumulators.
        pos = jnp.pad(pos, ((0, 0), (0, f_pad - f)), constant_values=_NEG_FILL)
    pos3 = pos.reshape(b, nb_pad, LANE)
    k_steps = nb_pad // tb

    pos_max, entropy = pl.pallas_call(
        _pos_stats_kernel,
        out_shape=(jax.ShapeDtypeStruct((1, 1), jnp.float32),
                   jax.ShapeDtypeStruct((1, 1), jnp.float32)),
        grid_spec=pltpu.PrefetchScalarGridSpec(
            num_scalar_prefetch=0,
            grid=(b, k_steps),                          # reduction axis last
            in_specs=[
                # Batch dim squeezed; kernel sees a fully packed (tb, 128) tile.
                pl.BlockSpec((None, tb, LANE), lambda bi, ki: (bi, ki, 0)),
            ],
            out_specs=[
                pl.BlockSpec((1, 1), lambda bi, ki: (0, 0)),
                pl.BlockSpec((1, 1), lambda bi, ki: (0, 0)),
            ],
            scratch_shapes=[pltpu.VMEM((1, 1), jnp.float32)] * 5,
        ),
        compiler_params=pltpu.CompilerParams(
            # Both axes carry resident accumulators / the resident output,
            # so both must be "arbitrary".
            dimension_semantics=("arbitrary", "arbitrary")),
    )(pos3)

    # Global max of the negative bag: a single XLA reduction is already
    # roofline-optimal; keeping it out of the kernel removes its DMA/VMEM cost.
    neg_max = jnp.max(negative_bag.astype(jnp.float32))

    loss = (1.0 - pos_max[0, 0] + neg_max
            + regularization_weight * entropy[0, 0])
    # "if loss < 0: return 0"
    return jnp.maximum(loss, 0.0)


def _reference(positive_bag, negative_bag, w=REG_WEIGHT):
    # pure-JAX reference for sanity check
    loss = 1.0 - jnp.max(positive_bag) + jnp.max(negative_bag)
    pos = jnp.reshape(positive_bag, (positive_bag.shape[0], -1))
    sm = jax.nn.softmax(pos, axis=1)
    lsm = jax.nn.log_softmax(pos, axis=1)
    reg = -jnp.sum(sm * lsm)
    return jnp.maximum(loss + w * reg, 0.0)


if __name__ == "__main__":
    key = jax.random.PRNGKey(0)
    k1, k2 = jax.random.split(key)
    # small NCHW bags, PyTorch-style
    positive_bag = jax.random.normal(k1, (2, 4, 16, 16), dtype=jnp.float32)
    negative_bag = jax.random.normal(k2, (2, 4, 16, 16), dtype=jnp.float32)

    loss = jax.block_until_ready(
        custom_loss_with_regularization(positive_bag, negative_bag)
    )
    ref = jax.block_until_ready(_reference(positive_bag, negative_bag))

    # Slightly relaxed tolerance: the restructured entropy + approx EUP
    # reciprocal differ from the reference at the ~1e-4..1e-3 level.
    assert jnp.allclose(loss, ref, rtol=2e-3, atol=2e-3), (loss, ref)
    print("KERNEL_OK")
</pallas_src>

<mosaic_0001>
module attributes {stable_mosaic.version = 11 : i64} {
  func.func @_pos_stats_kernel(%arg0: i32, %arg1: i32, %arg2: memref<1x8x128xf32, #tpu.memory_space<vmem>>, %arg3: memref<1x1xf32, #tpu.memory_space<vmem>>, %arg4: memref<1x1xf32, #tpu.memory_space<vmem>>, %arg5: memref<1x1xf32, #tpu.memory_space<vmem>>, %arg6: memref<1x1xf32, #tpu.memory_space<vmem>>, %arg7: memref<1x1xf32, #tpu.memory_space<vmem>>, %arg8: memref<1x1xf32, #tpu.memory_space<vmem>>, %arg9: memref<1x1xf32, #tpu.memory_space<vmem>>) attributes {dimension_semantics = [#tpu.dimension_semantics<arbitrary>, #tpu.dimension_semantics<arbitrary>], iteration_bounds = array<i64: 2, 1>, scalar_prefetch = 0 : i64, scratch_operands = 5 : i64, tpu.core_type = #tpu.core_type<tc>, window_params = [{transform_indices = @transform_0, window_bounds = array<i64: 1, 8, 128>}, {pipeline_mode = #tpu.pipeline_mode<synchronous>, transform_indices = @transform_1, window_bounds = array<i64: 1, 1>}, {pipeline_mode = #tpu.pipeline_mode<synchronous>, transform_indices = @transform_2, window_bounds = array<i64: 1, 1>}]} {
    %c0_i32 = arith.constant 0 : i32
    %0 = arith.cmpi eq, %arg0, %c0_i32 : i32
    %c0_i32_0 = arith.constant 0 : i32
    %1 = arith.cmpi eq, %arg1, %c0_i32_0 : i32
    %2 = arith.andi %0, %1 : i1
    %3 = arith.extui %2 : i1 to i32
    %c0_i32_1 = arith.constant 0 : i32
    %4 = arith.cmpi ne, %3, %c0_i32_1 : i32
    scf.if %4 {
      %cst_27 = arith.constant 0.000000e+00 : f32
      %50 = vector.broadcast %cst_27 : f32 to vector<1x1xf32>
      %c0_28 = arith.constant 0 : index
      %c0_29 = arith.constant 0 : index
      %51 = vector.load %arg8[%c0_28, %c0_29] : memref<1x1xf32, #tpu.memory_space<vmem>>, vector<1x1xf32>
      tpu.vector_store %arg8[%c0_28, %c0_29], %50 {strides = array<i32>} : memref<1x1xf32, #tpu.memory_space<vmem>>, vector<1x1xf32>,
      %cst_30 = arith.constant -1.000000e+30 : f32
      %52 = vector.broadcast %cst_30 : f32 to vector<1x1xf32>
      %c0_31 = arith.constant 0 : index
      %c0_32 = arith.constant 0 : index
      %53 = vector.load %arg9[%c0_31, %c0_32] : memref<1x1xf32, #tpu.memory_space<vmem>>, vector<1x1xf32>
      tpu.vector_store %arg9[%c0_31, %c0_32], %52 {strides = array<i32>} : memref<1x1xf32, #tpu.memory_space<vmem>>, vector<1x1xf32>,
    } else {
    }
    %c0_i32_2 = arith.constant 0 : i32
    %5 = arith.cmpi eq, %arg1, %c0_i32_2 : i32
    %6 = arith.extui %5 : i1 to i32
    %c0_i32_3 = arith.constant 0 : i32
    %7 = arith.cmpi ne, %6, %c0_i32_3 : i32
    scf.if %7 {
      %cst_27 = arith.constant -1.000000e+30 : f32
      %50 = vector.broadcast %cst_27 : f32 to vector<1x1xf32>
      %c0_28 = arith.constant 0 : index
      %c0_29 = arith.constant 0 : index
      %51 = vector.load %arg5[%c0_28, %c0_29] : memref<1x1xf32, #tpu.memory_space<vmem>>, vector<1x1xf32>
      tpu.vector_store %arg5[%c0_28, %c0_29], %50 {strides = array<i32>} : memref<1x1xf32, #tpu.memory_space<vmem>>, vector<1x1xf32>,
      %cst_30 = arith.constant 0.000000e+00 : f32
      %52 = vector.broadcast %cst_30 : f32 to vector<1x1xf32>
      %c0_31 = arith.constant 0 : index
      %c0_32 = arith.constant 0 : index
      %53 = vector.load %arg6[%c0_31, %c0_32] : memref<1x1xf32, #tpu.memory_space<vmem>>, vector<1x1xf32>
      tpu.vector_store %arg6[%c0_31, %c0_32], %52 {strides = array<i32>} : memref<1x1xf32, #tpu.memory_space<vmem>>, vector<1x1xf32>,
      %cst_33 = arith.constant 0.000000e+00 : f32
      %54 = vector.broadcast %cst_33 : f32 to vector<1x1xf32>
      %c0_34 = arith.constant 0 : index
      %c0_35 = arith.constant 0 : index
      %55 = vector.load %arg7[%c0_34, %c0_35] : memref<1x1xf32, #tpu.memory_space<vmem>>, vector<1x1xf32>
      tpu.vector_store %arg7[%c0_34, %c0_35], %54 {strides = array<i32>} : memref<1x1xf32, #tpu.memory_space<vmem>>, vector<1x1xf32>,
    } else {
    }
    %c0 = arith.constant 0 : index
    %c0_4 = arith.constant 0 : index
    %c0_5 = arith.constant 0 : index
    %8 = vector.load %arg2[%c0, %c0_4, %c0_5] : memref<1x8x128xf32, #tpu.memory_space<vmem>>, vector<1x8x128xf32>
    %9 = vector.shape_cast %8 : vector<1x8x128xf32> to vector<8x128xf32>
    %cst = arith.constant dense<0xFF800000> : vector<8xf32>
    %10 = vector.multi_reduction <maximumf>, %9, %cst [1] : vector<8x128xf32> to vector<8xf32>
    %11 = vector.shape_cast %10 : vector<8xf32> to vector<8x1xf32>
    %cst_6 = arith.constant dense<0xFF800000> : vector<1xf32>
    %12 = vector.multi_reduction <maximumf>, %11, %cst_6 [0] : vector<8x1xf32> to vector<1xf32>
    %13 = vector.shape_cast %12 : vector<1xf32> to vector<1x1xf32>
    %c0_7 = arith.constant 0 : index
    %c0_8 = arith.constant 0 : index
    %14 = vector.load %arg5[%c0_7, %c0_8] : memref<1x1xf32, #tpu.memory_space<vmem>>, vector<1x1xf32>
    %c0_9 = arith.constant 0 : index
    %c0_10 = arith.constant 0 : index
    %15 = vector.load %arg6[%c0_9, %c0_10] : memref<1x1xf32, #tpu.memory_space<vmem>>, vector<1x1xf32>
    %c0_11 = arith.constant 0 : index
    %c0_12 = arith.constant 0 : index
    %16 = vector.load %arg7[%c0_11, %c0_12] : memref<1x1xf32, #tpu.memory_space<vmem>>, vector<1x1xf32>
    %17 = arith.maximumf %14, %13 : vector<1x1xf32>
    %18 = arith.subf %14, %17 : vector<1x1xf32>
    %19 = math.exp %18 : vector<1x1xf32>
    %20 = vector.broadcast %17 : vector<1x1xf32> to vector<8x128xf32>
    %21 = arith.subf %9, %20 : vector<8x128xf32>
    %22 = math.exp %21 : vector<8x128xf32>
    %cst_13 = arith.constant dense<0.000000e+00> : vector<8xf32>
    %23 = vector.multi_reduction <add>, %22, %cst_13 [1] : vector<8x128xf32> to vector<8xf32>
    %24 = vector.shape_cast %23 : vector<8xf32> to vector<8x1xf32>
    %cst_14 = arith.constant dense<0.000000e+00> : vector<1xf32>
    %25 = vector.multi_reduction <add>, %24, %cst_14 [0] : vector<8x1xf32> to vector<1xf32>
    %26 = vector.shape_cast %25 : vector<1xf32> to vector<1x1xf32>
    %27 = arith.mulf %22, %21 : vector<8x128xf32>
    %cst_15 = arith.constant dense<0.000000e+00> : vector<8xf32>
    %28 = vector.multi_reduction <add>, %27, %cst_15 [1] : vector<8x128xf32> to vector<8xf32>
    %29 = vector.shape_cast %28 : vector<8xf32> to vector<8x1xf32>
    %cst_16 = arith.constant dense<0.000000e+00> : vector<1xf32>
    %30 = vector.multi_reduction <add>, %29, %cst_16 [0] : vector<8x1xf32> to vector<1xf32>
    %31 = vector.shape_cast %30 : vector<1xf32> to vector<1x1xf32>
    %32 = arith.mulf %19, %15 : vector<1x1xf32>
    %33 = arith.addf %32, %26 : vector<1x1xf32>
    %c0_17 = arith.constant 0 : index
    %c0_18 = arith.constant 0 : index
    %34 = vector.load %arg6[%c0_17, %c0_18] : memref<1x1xf32, #tpu.memory_space<vmem>>, vector<1x1xf32>
    tpu.vector_store %arg6[%c0_17, %c0_18], %33 {strides = array<i32>} : memref<1x1xf32, #tpu.memory_space<vmem>>, vector<1x1xf32>,
    %35 = arith.subf %14, %17 : vector<1x1xf32>
    %36 = arith.mulf %35, %15 : vector<1x1xf32>
    %37 = arith.addf %16, %36 : vector<1x1xf32>
    %38 = arith.mulf %19, %37 : vector<1x1xf32>
    %39 = arith.addf %38, %31 : vector<1x1xf32>
    %c0_19 = arith.constant 0 : index
    %c0_20 = arith.constant 0 : index
    %40 = vector.load %arg7[%c0_19, %c0_20] : memref<1x1xf32, #tpu.memory_space<vmem>>, vector<1x1xf32>
    tpu.vector_store %arg7[%c0_19, %c0_20], %39 {strides = array<i32>} : memref<1x1xf32, #tpu.memory_space<vmem>>, vector<1x1xf32>,
    %c0_21 = arith.constant 0 : index
    %c0_22 = arith.constant 0 : index
    %41 = vector.load %arg5[%c0_21, %c0_22] : memref<1x1xf32, #tpu.memory_space<vmem>>, vector<1x1xf32>
    tpu.vector_store %arg5[%c0_21, %c0_22], %17 {strides = array<i32>} : memref<1x1xf32, #tpu.memory_space<vmem>>, vector<1x1xf32>,
    %c0_i32_23 = arith.constant 0 : i32
    %42 = arith.cmpi eq, %arg1, %c0_i32_23 : i32
    %43 = arith.extui %42 : i1 to i32
    %c0_i32_24 = arith.constant 0 : i32
    %44 = arith.cmpi ne, %43, %c0_i32_24 : i32
    scf.if %44 {
      %c0_27 = arith.constant 0 : index
      %c0_28 = arith.constant 0 : index
      %50 = vector.load %arg6[%c0_27, %c0_28] : memref<1x1xf32, #tpu.memory_space<vmem>>, vector<1x1xf32>
      %51 = math.log %50 : vector<1x1xf32>
      %c0_29 = arith.constant 0 : index
      %c0_30 = arith.constant 0 : index
      %52 = vector.load %arg7[%c0_29, %c0_30] : memref<1x1xf32, #tpu.memory_space<vmem>>, vector<1x1xf32>
      %53 = tpu.reciprocal %50 {approx = true} : vector<1x1xf32> -> vector<1x1xf32>
      %54 = arith.mulf %52, %53 : vector<1x1xf32>
      %55 = arith.subf %51, %54 : vector<1x1xf32>
      %c0_31 = arith.constant 0 : index
      %c0_32 = arith.constant 0 : index
      %56 = vector.load %arg8[%c0_31, %c0_32] : memref<1x1xf32, #tpu.memory_space<vmem>>, vector<1x1xf32>
      %57 = arith.addf %56, %55 : vector<1x1xf32>
      %c0_33 = arith.constant 0 : index
      %c0_34 = arith.constant 0 : index
      %58 = vector.load %arg8[%c0_33, %c0_34] : memref<1x1xf32, #tpu.memory_space<vmem>>, vector<1x1xf32>
      tpu.vector_store %arg8[%c0_33, %c0_34], %57 {strides = array<i32>} : memref<1x1xf32, #tpu.memory_space<vmem>>, vector<1x1xf32>,
      %c0_35 = arith.constant 0 : index
      %c0_36 = arith.constant 0 : index
      %59 = vector.load %arg9[%c0_35, %c0_36] : memref<1x1xf32, #tpu.memory_space<vmem>>, vector<1x1xf32>
      %c0_37 = arith.constant 0 : index
      %c0_38 = arith.constant 0 : index
      %60 = vector.load %arg5[%c0_37, %c0_38] : memref<1x1xf32, #tpu.memory_space<vmem>>, vector<1x1xf32>
      %61 = arith.maximumf %59, %60 : vector<1x1xf32>
      %c0_39 = arith.constant 0 : index
      %c0_40 = arith.constant 0 : index
      %62 = vector.load %arg9[%c0_39, %c0_40] : memref<1x1xf32, #tpu.memory_space<vmem>>, vector<1x1xf32>
      tpu.vector_store %arg9[%c0_39, %c0_40], %61 {strides = array<i32>} : memref<1x1xf32, #tpu.memory_space<vmem>>, vector<1x1xf32>,
    } else {
    }
    %c1_i32 = arith.constant 1 : i32
    %45 = arith.cmpi eq, %arg0, %c1_i32 : i32
    %c0_i32_25 = arith.constant 0 : i32
    %46 = arith.cmpi eq, %arg1, %c0_i32_25 : i32
    %47 = arith.andi %45, %46 : i1
    %48 = arith.extui %47 : i1 to i32
    %c0_i32_26 = arith.constant 0 : i32
    %49 = arith.cmpi ne, %48, %c0_i32_26 : i32
    scf.if %49 {
      %c0_27 = arith.constant 0 : index
      %c0_28 = arith.constant 0 : index
      %50 = vector.load %arg9[%c0_27, %c0_28] : memref<1x1xf32, #tpu.memory_space<vmem>>, vector<1x1xf32>
      %c0_29 = arith.constant 0 : index
      %c0_30 = arith.constant 0 : index
      %51 = vector.load %arg3[%c0_29, %c0_30] : memref<1x1xf32, #tpu.memory_space<vmem>>, vector<1x1xf32>
      tpu.vector_store %arg3[%c0_29, %c0_30], %50 {strides = array<i32>} : memref<1x1xf32, #tpu.memory_space<vmem>>, vector<1x1xf32>,
      %c0_31 = arith.constant 0 : index
      %c0_32 = arith.constant 0 : index
      %52 = vector.load %arg8[%c0_31, %c0_32] : memref<1x1xf32, #tpu.memory_space<vmem>>, vector<1x1xf32>
      %c0_33 = arith.constant 0 : index
      %c0_34 = arith.constant 0 : index
      %53 = vector.load %arg4[%c0_33, %c0_34] : memref<1x1xf32, #tpu.memory_space<vmem>>, vector<1x1xf32>
      tpu.vector_store %arg4[%c0_33, %c0_34], %52 {strides = array<i32>} : memref<1x1xf32, #tpu.memory_space<vmem>>, vector<1x1xf32>,
    } else {
    }
    return
  }
  func.func @transform_0(%arg0: i32, %arg1: i32) -> (i32, i32, i32) {
    %c0_i32 = arith.constant 0 : i32
    %c0_i32_0 = arith.constant 0 : i32
    return %arg0, %arg1, %c0_i32 : i32, i32, i32
  }
  func.func @transform_1(%arg0: i32, %arg1: i32) -> (i32, i32) {
    %c0_i32 = arith.constant 0 : i32
    %c0_i32_0 = arith.constant 0 : i32
    %c0_i32_1 = arith.constant 0 : i32
    return %c0_i32, %c0_i32_0 : i32, i32
  }
  func.func @transform_2(%arg0: i32, %arg1: i32) -> (i32, i32) {
    %c0_i32 = arith.constant 0 : i32
    %c0_i32_0 = arith.constant 0 : i32
    %c0_i32_1 = arith.constant 0 : i32
    return %c0_i32, %c0_i32_0 : i32, i32
  }
}

</mosaic_0001>

<bundles_post_ra>
// kernel: tpu_custom_call.1
= control target key start
LH: loop header
LB: loop body
LE: loop exit
PB: predicated region body
PF: predicated region fallthrough
CT: control target
= control target key end

     0   :  { %8 = vsyncpa [#allocation8], 0  ;;  %s806_s0 = inlined_call_operand.hbm [shape: f32[2,8,128], index: 0, kind: input, shape index: {}]   ;;  %s807_s1 = inlined_call_operand.hbm [shape: f32[1,1], index: 1, kind: output, shape index: {0}]   ;;  %s808_s2 = inlined_call_operand.hbm [shape: f32[1,1], index: 2, kind: output, shape index: {1}]  }
   0x1   :  { %10 = vsyncpa [#allocation8 + $0x1], 0 }
   0x2   :  { %11 = vsyncpa [#allocation9], 0 }
   0x3   :  { %12 = vsyncpa [#allocation12], 0  ;;  %s612_s9 = smov 0   ;;  %s614_s10 = smov 0  }
   0x4   :  { %s616_s11 = smov 0   ;;  %s618_s12 = smov 0  }
   0x5   :  { %s620_s13 = smov 0   ;;  %s622_s14 = smov 0  }
   0x6 LB: > { %s347_s15 = sadd.s32 4294967295, %s587_s14   ;;  %s30_s16 = sadd.s32 1, %s583_s13  ;;  %s587_s14 = sphi %s622_s14, %s18_s14   ;;  %s583_s13 = sphi %s620_s13, %s819_s13   ;;  %s579_s12 = sphi %s618_s12, %s818_s12   ;;  %s575_s11 = sphi %s616_s11, %s817_s11   ;;  %s571_s10 = sphi %s614_s10, %s816_s10   ;;  %s567_s9 = sphi %s612_s9, %s815_s9  }
   0x7   : > { %p32_p0 = scmp.ge.s32.totalorder %s30_s16, 2  ;;  %s39_s17 = sadd.s32 1, %s575_s11 }
   0x8   : > { %p46_p1 = scmp.ne.s32.totalorder %s575_s11, %s571_s10  ;;  %p47_p2 = scmp.eq.s32.totalorder %s587_s14, 0 }
   0x9   : > { %s821_s16 = smov (%p32_p0, %s30_s16), 0  ;;  %p52_p4 = scmp.ne.s32.totalorder %s571_s10, %s567_s9 }
   0xa   : > { %p648_p3 = por %p47_p2, %p46_p1  ;;  %s34_s19 = ssub.s32 %s583_s13, %s821_s16 }
   0xb   : > { %p53_p5 = scmp.eq.s32.totalorder %s347_s15, 0  ;;  %p37_p6 = scmp.eq.s32.totalorder %s34_s19, 0 }
   0xc   : > { %p378_p8 = scmp.lt.s32.totalorder %s587_s14, 2  ;;  %s118_s22 = sand.u32 1, %s575_s11  }
   0xd   : > { %p657_p7 = por %p53_p5, %p52_p4  ;;  %s351_s23 = sshll.u32 %s583_s13, 7 }
   0xe   : > { %s663_s21 = scalar_select %p37_p6, %s575_s11, %s39_s17  }
   0xf   : > { %s350_s24 = sshll.u32 %s118_s22, 3  ;;  %s670_s27 = scalar_lea.hbm %s806_s0, %s351_s23 }
  0x10   : > { %s122_s28 = scalar_lea.vmem [#allocation7], %s350_s24  ;;  %p674_p9 = pnand %p378_p8, %p648_p3 }
  0x11   : > { %s130_s29 = sshll.u32 %s122_s28, 4  ;;  %s119_s3 = scalar_lea.sflag [#allocation8], %s118_s22  ;;  %s678_s29 = int_to_ptr.vmem [resolvable:$true] %s130_s29 }
  0x12   : > { %s447_s4 = scalar_lea.hbm %s670_s27, 128  ;;  %p449_p13 = pneg %p674_p9 }
  0x13   : > { %p448_p12 = scmp.ne.s32.totalorder %s670_s27, %s447_s4  ;;  %s452_s7 = scalar_lea.hbm %s806_s0, 256 }
  0x14   : > { %p453_p2 = scmp.lt.u32.totalorder %s670_s27, %s806_s0  ;;  %p454_p3 = scmp.lt.u32.totalorder %s452_s7, %s447_s4 }
  0x15   : > { %p450_p0 = pnand %p449_p13, %p448_p12  ;;  %p456_p5 = scmp.lt.u32.totalorder %s447_s4, %s670_s27 }
  0x16   : > { %p455_p4 = por %p454_p3, %p453_p2 }
  0x17   : > { %p451_p1 = pneg %p450_p0 }
  0x18   : > { %p457_p6 = por %p456_p5, %p455_p4 }
  0x1a   : > { %p458_p8 = pnand %p457_p6, %p451_p1 }
  0x1c   : > { %461 = shalt.err (!%p458_p8)
}
  0x1d   : > { %s462_s17 = scalar_lea.vmem %s678_s29, 128  ;;  %s589_s18 = smov [#allocation7]  }
  0x1e   : > { %p463_p12 = scmp.ne.s32.totalorder %s678_s29, %s462_s17  ;;  %s467_s19 = sshll.u32 %s589_s18, 4  ;;  %s468_s19 = int_to_ptr.vmem [resolvable:$false] %s467_s19 }
  0x1f   : > { %s469_s22 = scalar_lea.vmem %s468_s19, 256  ;;  %p470_p11 = scmp.lt.s32.totalorder %s678_s29, %s468_s19 }
  0x20   : > { %p465_p0 = pnand %p463_p12, %p449_p13  ;;  %p471_p2 = scmp.lt.s32.totalorder %s469_s22, %s462_s17 }
  0x22   : > { %p466_p10 = pneg %p465_p0  ;;  %p472_p3 = por %p471_p2, %p470_p11 }
  0x24   : > { %p473_p4 = pnand %p472_p3, %p466_p10 }
  0x26   : > { %476 = shalt.err (!%p473_p4)
}
  0x27   : > { %377 = dma.hbm_to_vmem [thread:$0]  (!%p674_p9), %s670_s27, 128, %s678_s29, %s119_s3  }
  0x28   : > { %p812_p1 = scmp.lt.s32.totalorder %s587_s14, 3  ;;  %p813_p5 = scmp.ge.s32.totalorder %s587_s14, 1 }
  0x2a   : > { %p136_p13 = pnand %p813_p5, %p812_p1 }
  0x2b   : > { %s141_s23 = sand.u32 (!%p136_p13), 1, %s571_s10  }
  0x2c   : > { %139 = sbr.rel (%p136_p13) target bundleno = 602 (0x25a), region = 24  ;;  %s353_s24 = sshll.u32 (!%p136_p13), %s141_s23, 3 }
  0x2d   : > { %s142_s25 = scalar_lea.sflag (!%p136_p13), [#allocation8], %s141_s23  ;;  %s145_s26 = scalar_lea.vmem (!%p136_p13), [#allocation7], %s353_s24 }
  0x33   : > { %554 = dma.done.wait (%p657_p7), %s142_s25, 128  }
  0x34   : > { %556 = vsyncadd (%p657_p7), %s142_s25, 4294967168  ;;  %p161_p10 = scmp.eq.s32.totalorder %s579_s12, 0 }
  0x35   : > { %vm167_vm0 = vcmask (%p161_p10), 0   ;;  %v590_v0 = vmov (%p161_p10), 0.0   ;;  %v591_v1 = vmov (%p161_p10), -1e+30  }
  0x36   : > { %166 = sbr.rel (!%p161_p10) target bundleno = 61 (0x3d), region = 32  ;;  %168 = vst.msk [vmem:[#allocation5] sm:$0x1] (%p161_p10), %vm167_vm0, %v590_v0  ;;  %169 = vst.msk [vmem:[#allocation6] sm:$0x1] (%p161_p10), %vm167_vm0, %v591_v1 }
  0x3d PF: > { %v177_v2 = vld [vmem:[%s145_s26] sm:$0xff]  ;;  %vm173_vm1 = vcmask 0   ;;  %v592_v3 = vmov -1e+30   ;;  %v593_v4 = vmov 0.0   ;;  %v594_v5 = vmov 0  }
  0x3e   : > { %178 = vmax.xlane.f32.xlu0 %v177_v2  ;;  %174 = vst.msk [vmem:[#allocation2] sm:$0x1] %vm173_vm1, %v592_v3  ;;  %175 = vst.msk [vmem:[#allocation3] sm:$0x1] %vm173_vm1, %v593_v4  ;;  %v194_v9 = vlaneseq  ;;  %v245_v20 = vld [vmem:[#allocation6] sm:$0x1] }
  0x3f   : > { %176 = vst.msk [vmem:[#allocation4] sm:$0x1] %vm173_vm1, %v593_v4  ;;  %438 = vset.pattern.permute.xlu0 %v594_v5  ;;  %p249_p7 = scmp.eq.s32.totalorder %s579_s12, 1  ;;  %v242_v58 = vld [vmem:[#allocation5] sm:$0x1] }
  0x40   : > { %v195_v12 = vshrl.u32 %v194_v9, 7 }
  0x42   : > { %v196_v16 = vsub.s32 0, %v195_v12 }
  0x45   : > { %v186_v14 = vld [vmem:[#allocation2] sm:$0x1]  ;;  %v187_v35 = vld [vmem:[#allocation3] sm:$0x1] }
  0x46   : > { %v188_v42 = vld [vmem:[#allocation4] sm:$0x1] }
  0xcb   : > { %v179_v6 = vpop.xlane.xlu0 %178 }
  0xcc   : > { %v180_v7 = vrot.slane %v179_v6, 4 }
  0xce   : > { %v181_v8 = vmax.f32 %v179_v6, %v180_v7 }
  0xd0   : > { %v182_v10 = vrot.slane %v181_v8, 2 }
  0xd2   : > { %v183_v11 = vmax.f32 %v181_v8, %v182_v10 }
  0xd4   : > { %v184_v13 = vrot.slane %v183_v11, 1 }
  0xd6   : > { %v185_v15 = vmax.f32 %v183_v11, %v184_v13 }
  0xd8   : > { %v189_v17 = vmax.f32 %v186_v14, %v185_v15 }
  0xda   : > { %v190_v18 = vsub.f32 %v186_v14, %v189_v17  ;;  %231 = vst.msk [vmem:[#allocation2] sm:$0x1] %vm173_vm1, %v189_v17  ;;  %v197_v19 = vrot.slane %v189_v17, %v196_v16 }
  0xdc   : > { %199 = vperm.xlu0 %438, %v197_v19   ;;  %v191_v28 = vmul.f32 1.442695, %v190_v18  ;;  %v226_v41 = vmul.f32 %v190_v18, %v187_v35 }
  0xde   : > { %v227_v48 = vadd.f32 %v226_v41, %v188_v42 }
  0xe1   : > { %v246_v21 = vld [vmem:[#allocation2] sm:$0x1] }
  0xe2   : > { %v247_v22 = vmax.f32 %v245_v20, %v246_v21 }
  0xe4   : > { %248 = vst.msk [vmem:[#allocation6] sm:$0x1] %vm173_vm1, %v247_v22 }
  0xeb   : > { %v254_v61 = vld [vmem:[#allocation6] sm:$0x1] (%p249_p7) }
  0xec   : > { %255 = vst.msk [vmem:[#allocation10] sm:$0x1] (%p249_p7), %vm173_vm1, %v254_v61 }
 0x15b   : > { %v200_v23 = vpop.permute.xlu0 %199 }
 0x15c   : > { %v202_v24 = vsub.f32 %v177_v2, %v200_v23 }
 0x15e   : > { %v203_v25 = vmul.f32 1.442695, %v202_v24 }
 0x160   : > { %439 = vpow2.f32 %v203_v25 }
 0x161   : > { %441 = vpow2.f32 %v191_v28 }
 0x16a   : > { %v440_v26 = vpop.eup %439 }
 0x16b   : > { %205 = vadd.xlane.f32.xlu1 %v440_v26  ;;  %v213_v27 = vmul.f32 %v440_v26, %v202_v24  ;;  %v442_v38 = vpop.eup %441 }
 0x16c   : > { %v222_v44 = vmul.f32 %v442_v38, %v187_v35  ;;  %v228_v50 = vmul.f32 %v442_v38, %v227_v48 }
 0x16f   : > { %214 = vadd.xlane.f32.xlu1 %v213_v27 }
 0x1f8   : > { %v206_v29 = vpop.xlane.xlu1 %205 }
 0x1f9   : > { %v207_v30 = vrot.slane %v206_v29, 4 }
 0x1fb   : > { %v208_v31 = vadd.f32 %v207_v30, %v206_v29 }
 0x1fc   : > { %v215_v32 = vpop.xlane.xlu1 %214 }
 0x1fd   : > { %v209_v33 = vrot.slane %v208_v31, 2  ;;  %v216_v34 = vrot.slane %v215_v32, 4 }
 0x1ff   : > { %v210_v36 = vadd.f32 %v209_v33, %v208_v31  ;;  %v217_v37 = vadd.f32 %v216_v34, %v215_v32 }
 0x201   : > { %v211_v39 = vrot.slane %v210_v36, 1  ;;  %v218_v40 = vrot.slane %v217_v37, 2 }
 0x203   : > { %v212_v43 = vadd.f32 %v211_v39, %v210_v36  ;;  %v219_v45 = vadd.f32 %v218_v40, %v217_v37 }
 0x205   : > { %v223_v46 = vadd.f32 %v222_v44, %v212_v43  ;;  %v220_v47 = vrot.slane %v219_v45, 1 }
 0x207   : > { %225 = vst.msk [vmem:[#allocation3] sm:$0x1] %vm173_vm1, %v223_v46  ;;  %v221_v49 = vadd.f32 %v220_v47, %v219_v45 }
 0x209   : > { %v229_v51 = vadd.f32 %v228_v50, %v221_v49 }
 0x20b   : > { %230 = vst.msk [vmem:[#allocation4] sm:$0x1] %vm173_vm1, %v229_v51 }
 0x20e   : > { %v235_v52 = vld [vmem:[#allocation3] sm:$0x1] }
 0x20f   : > { %443 = vlog2.f32 %v235_v52 }
 0x210   : > { %445 = vrcp.f32 %v235_v52 }
 0x212   : > { %v238_v56 = vld [vmem:[#allocation4] sm:$0x1] }
 0x219   : > { %v444_v53 = vpop.eup %443 }
 0x21a   : > { %v446_v54 = vpop.eup %445  ;;  %v237_v55 = vmul.f32 0.6931472, %v444_v53 }
 0x21b   : > { %v240_v57 = vmul.f32 %v446_v54, %v238_v56  ;;  %253 = sbr.rel (!%p249_p7) target bundleno = 554 (0x22a), region = 44 }
 0x21d   : > { %v241_v59 = vsub.f32 %v237_v55, %v240_v57 }
 0x21f   : > { %v243_v60 = vadd.f32 %v242_v58, %v241_v59 }
 0x221   : > { %244 = vst.msk [vmem:[#allocation5] sm:$0x1] %vm173_vm1, %v243_v60 }
 0x228   : > { %v256_v62 = vld [vmem:[#allocation5] sm:$0x1] }
 0x229   : > { %257 = vst.msk [vmem:[#allocation11] sm:$0x1] %vm173_vm1, %v256_v62 }
 0x22a PF: > { %p732_p9 = scmp.eq.s32.totalorder %s347_s15, 1  ;;  %s595_s27 = smov [#allocation10]  }
 0x22b   : > { %s265_s28 = sshll.u32 %s595_s27, 4  ;;  %s596_s29 = smov [#allocation11]   ;;  %s266_s28 = int_to_ptr.vmem [resolvable:$true] %s265_s28 }
 0x22c   : > { %s276_s30 = sshll.u32 %s596_s29, 4  ;;  %s477_s12 = scalar_lea.vmem %s266_s28, 16  ;;  %s736_s30 = int_to_ptr.vmem [resolvable:$true] %s276_s30 }
 0x22d   : > { %p478_p11 = scmp.ne.s32.totalorder %s266_s28, %s477_s12  ;;  %s483_s3 = scalar_lea.vmem %s266_s28, 32 }
 0x22e   : > { %p484_p12 = scmp.lt.s32.totalorder %s266_s28, %s266_s28  ;;  %p485_p0 = scmp.lt.s32.totalorder %s483_s3, %s477_s12 }
 0x22f   : > { %p479_p6 = pnand %p478_p11, %p732_p9 }
 0x230   : > { %p486_p2 = por %p485_p0, %p484_p12 }
 0x231   : > { %p480_p8 = pneg %p479_p6 }
 0x233   : > { %p487_p3 = pnand %p486_p2, %p480_p8 }
 0x235   : > { %490 = shalt.err (!%p487_p3)
}
 0x236   : > { %s491_s5 = scalar_lea.hbm %s807_s1, 16 }
 0x237   : > { %p492_p4 = scmp.ne.s32.totalorder %s807_s1, %s491_s5  ;;  %p497_p13 = scmp.lt.u32.totalorder %s491_s5, %s807_s1 }
 0x239   : > { %p493_p1 = pnand %p492_p4, %p732_p9 }
 0x23b   : > { %p494_p5 = pneg %p493_p1 }
 0x23d   : > { %p499_p10 = pnand %p497_p13, %p494_p5 }
 0x23f   : > { %502 = shalt.err (!%p499_p10)
}
 0x240   : > { %367 = dma.vmem_to_hbm [thread:$0]  (%p732_p9), %s266_s28, 16, %s807_s1, [#allocation9]  }
 0x241   : > { %s503_s19 = scalar_lea.vmem %s736_s30, 16  ;;  %s509_s22 = scalar_lea.vmem %s736_s30, 32 }
 0x242   : > { %p504_p7 = scmp.ne.s32.totalorder %s736_s30, %s503_s19  ;;  %p510_p8 = scmp.lt.s32.totalorder %s736_s30, %s736_s30 }
 0x243   : > { %p511_p12 = scmp.lt.s32.totalorder %s509_s22, %s503_s19 }
 0x244   : > { %p505_p11 = pnand %p504_p7, %p732_p9 }
 0x245   : > { %p512_p0 = por %p511_p12, %p510_p8 }
 0x246   : > { %p506_p6 = pneg %p505_p11 }
 0x248   : > { %p513_p2 = pnand %p512_p0, %p506_p6 }
 0x24a   : > { %516 = shalt.err (!%p513_p2)
}
 0x24b   : > { %s517_s25 = scalar_lea.hbm %s808_s2, 16 }
 0x24c   : > { %p518_p3 = scmp.ne.s32.totalorder %s808_s2, %s517_s25  ;;  %p523_p5 = scmp.lt.u32.totalorder %s517_s25, %s808_s2 }
 0x24e   : > { %p519_p4 = pnand %p518_p3, %p732_p9 }
 0x250   : > { %p520_p1 = pneg %p519_p4 }
 0x252   : > { %p525_p13 = pnand %p523_p5, %p520_p1 }
 0x254   : > { %528 = shalt.err (!%p525_p13)
}
 0x255   : > { %369 = dma.vmem_to_hbm [thread:$0]  (%p732_p9), %s736_s30, 16, %s808_s2, [#allocation12]  }
 0x256   : > { %558 = dma.done.wait (%p732_p9), [#allocation9], 16  }
 0x257   : > { %560 = vsyncadd (%p732_p9), [#allocation9], 4294967280 }
 0x258   : > { %562 = dma.done.wait (%p732_p9), [#allocation12], 16  }
 0x259   : > { %564 = vsyncadd (%p732_p9), [#allocation12], 4294967280 }
 0x25a PF: > { %s18_s14 = sadd.s32 1, %s587_s14   ;;  %s815_s9 = smov %s571_s10 }
 0x25b   : > { %p15_p10 = scmp.ge.s32.totalorder %s18_s14, 4   ;;  %s816_s10 = smov %s575_s11 }
 0x25c   : > { %s817_s11 = smov %s663_s21  ;;  %s818_s12 = smov %s583_s13 }
 0x25d   : > { %s819_s13 = smov %s821_s16  ;;  %17 = sbr.rel (!%p15_p10) target bundleno = 6 (0x6), region = 85 }
 0x264   :  { %293 = vsyncpa [#allocation8], 1 }
 0x265   :  { %295 = vsyncpa [#allocation8 + $0x1], 1 }
 0x266   :  { %296 = vsyncpa [#allocation9], 1 }
 0x267   :  { %298 = vsyncpa [#allocation9 + $0x1], 1 }
 0x268   :  { %299 = vsyncpa [#allocation12], 1 }

</bundles_post_ra>
